<compile_context>
chip_gen: v6e
topology: v6e:2x2x1
jax: 0.10.0
libtpu: 0.0.40
codegen_flags: <defaults>
</compile_context>

<pallas_src>
import jax
import jax.numpy as jnp
from jax.experimental import pallas as pl
from jax.experimental.pallas import tpu as pltpu

WN_DIM = 8            # weight-net output channels (Conv2dNormRelu(3, 8))
LEAKY_SLOPE = 0.1     # nn.LeakyReLU(0.1)

MLP_ROW_TILE = 2048   # rows per grid step for the fused MLP kernel (B*N flattened)
PC_ROW_TILE = 512     # query points per grid step for PointConv


def _leaky(x):
    return jnp.where(x >= 0, x, LEAKY_SLOPE * x)


def _round_up(x, m):
    return ((x + m - 1) // m) * m


def _vmem_limit(block_bytes, scratch_bytes=0, const_bytes=0):
    """Derived per-kernel VMEM budget: double-buffered pipelined blocks plus
    scratch / constant weights plus headroom for in-kernel f32 intermediates.
    Kept well below v7x's 64 MiB per-TC VMEM (and v5e/v6e's 128 MiB)."""
    need = 2 * block_bytes + scratch_bytes + const_bytes
    return int(min(96 << 20, max(24 << 20, 3 * need + (8 << 20))))


# ----------------------------------------------------------------------------
# Kernel 1: fused two-layer pointwise MLP (MLP1d with two Conv1dNormRelu layers)
# ----------------------------------------------------------------------------
def _make_mlp2_kernel(cin, use_fma):
    def kernel(x_ref, w1_ref, b1_ref, w2_ref, b2_ref, o_ref):
        x = x_ref[...]                                         # [TN, Cin]
        b1 = b1_ref[...]                                       # [1, C1] f32
        if use_fma:
            # Cin <= 4: contraction as a few VPU FMAs instead of a <3%-utilized
            # MXU pass (level-0 input has Cin = 3).
            w1 = w1_ref[...]                                   # [Cin, C1] f32
            h = b1 + x[:, 0:1] * w1[0:1, :]
            for d in range(1, cin):
                h = h + x[:, d:d + 1] * w1[d:d + 1, :]
        else:
            h = jnp.dot(x, w1_ref[...],
                        preferred_element_type=jnp.float32) + b1
        h = _leaky(h)
        y = jnp.dot(h.astype(w2_ref.dtype), w2_ref[...],
                    preferred_element_type=jnp.float32) + b2_ref[...]
        o_ref[...] = _leaky(y).astype(o_ref.dtype)
    return kernel


def mlp1d_two_layer(x_bnc, w1, b1, w2, b2):
    """Fused MLP1d (two 1x1 convs + LeakyReLU). [B, N, Cin] -> [B, N, C2] bf16."""
    B, N, cin = x_bnc.shape
    c1, c2 = w1.shape[1], w2.shape[1]
    use_fma = cin <= 4

    # Pointwise op: flatten batch into the row axis so tiles stay large even at
    # small pyramid levels and the 1-D grid splits across v7x's 2 TensorCores.
    x2 = x_bnc.reshape(B * N, cin)
    if use_fma:
        x2 = x2.astype(jnp.float32)
        w1 = w1.astype(jnp.float32)
    else:
        x2 = x2.astype(jnp.bfloat16)
        w1 = w1.astype(jnp.bfloat16)
    w2 = w2.astype(jnp.bfloat16)
    b1 = b1.astype(jnp.float32)
    b2 = b2.astype(jnp.float32)

    rows = B * N
    tn = MLP_ROW_TILE if rows >= MLP_ROW_TILE else _round_up(rows, 8)
    rows_pad = _round_up(rows, tn)
    if rows_pad != rows:
        # Pad instead of shrinking the tile (no tn=8 degradation / giant block).
        x2 = jnp.pad(x2, ((0, rows_pad - rows), (0, 0)))

    grid = (rows_pad // tn,)
    flops = int(2 * rows * (cin * c1 + c1 * c2))
    bytes_accessed = int(x2.size * x2.dtype.itemsize
                         + w1.size * w1.dtype.itemsize + w2.size * 2
                         + rows_pad * c2 * 2)
    block_bytes = tn * cin * x2.dtype.itemsize + tn * c2 * 2
    const_bytes = cin * c1 * w1.dtype.itemsize + c1 * c2 * 2 + (c1 + c2) * 4
    scratch_bytes = tn * (c1 + c2) * 4        # in-kernel f32 intermediates

    out = pl.pallas_call(
        _make_mlp2_kernel(cin, use_fma),
        out_shape=jax.ShapeDtypeStruct((rows_pad, c2), jnp.bfloat16),
        grid=grid,
        in_specs=[
            pl.BlockSpec((tn, cin), lambda t: (t, 0)),
            pl.BlockSpec((cin, c1), lambda t: (0, 0)),
            pl.BlockSpec((1, c1), lambda t: (0, 0)),
            pl.BlockSpec((c1, c2), lambda t: (0, 0)),
            pl.BlockSpec((1, c2), lambda t: (0, 0)),
        ],
        out_specs=pl.BlockSpec((tn, c2), lambda t: (t, 0)),
        compiler_params=pltpu.CompilerParams(
            dimension_semantics=("parallel",),
            vmem_limit_bytes=_vmem_limit(block_bytes, scratch_bytes, const_bytes)),
        cost_estimate=pl.CostEstimate(flops=flops, transcendentals=0,
                                      bytes_accessed=bytes_accessed),
    )(x2, w1, b1, w2, b2)
    return out[:rows].reshape(B, N, c2)


# ----------------------------------------------------------------------------
# Kernel 2: PointConv aggregation (weighted neighbor aggregation + Linear)
# ----------------------------------------------------------------------------
def _make_pointconv_kernel(K, WN, C, COUT, group):
    def kernel(wk_ref, feat_ref, lin_w_ref, lin_b_ref, o_ref, mid_ref):
        wk = wk_ref[0].astype(jnp.float32)           # [TM, WN*K], col = wi*K + k

        # wi outer / k inner with a single live accumulator per output slice
        # (no WN-way accumulator list -> no vreg spills); finished slices are
        # packed into mid_ref with 128-lane-aligned grouped stores.
        for w0 in range(0, WN, group):
            hi = min(w0 + group, WN)
            slices = []
            for wi in range(w0, hi):
                acc = None
                for k in range(K):                   # static unroll (K small)
                    fk = feat_ref[0, k].astype(jnp.float32)      # [TM, C]
                    wcol = wk[:, wi * K + k:wi * K + k + 1]      # [TM, 1]
                    term = wcol * fk
                    acc = term if acc is None else acc + term
                slices.append(acc.astype(mid_ref.dtype))
            blk = slices[0] if len(slices) == 1 else jnp.concatenate(slices, axis=-1)
            mid_ref[:, w0 * C:hi * C] = blk

        # Final Linear(WN*C -> Cout): ONE MXU matmul on the packed intermediate
        # (row index w*C + c matches torch's .view flattening).
        out = jnp.dot(mid_ref[...], lin_w_ref[...],
                      preferred_element_type=jnp.float32) + lin_b_ref[...]
        o_ref[0] = _leaky(out).astype(o_ref.dtype)
    return kernel


def pointconv_aggregate(wk_bmx, knn_feat_bkmc, lin_w_flat, lin_b):
    """
    wk_bmx        : [B, M, WN*K]  precomputed weight-net outputs, col = wi*K + k
    knn_feat_bkmc : [B, K, M, C]  gathered neighbor features (K-major layout)
    lin_w_flat    : [WN*C, Cout]  row index = w*C + c
    lin_b         : [1, Cout]
    returns       : [B, M, Cout]  bf16
    """
    B, M, WK = wk_bmx.shape
    K = knn_feat_bkmc.shape[1]
    C = knn_feat_bkmc.shape[-1]
    WN = WK // K
    COUT = lin_b.shape[-1]

    wk = wk_bmx.astype(jnp.bfloat16)
    feat = knn_feat_bkmc.astype(jnp.bfloat16)
    lin_w = lin_w_flat.astype(jnp.bfloat16)
    lin_bf = lin_b.astype(jnp.float32)

    tm = PC_ROW_TILE if M >= PC_ROW_TILE else _round_up(M, 8)
    m_pad = _round_up(M, tm)
    if m_pad != M:
        wk = jnp.pad(wk, ((0, 0), (0, m_pad - M), (0, 0)))
        feat = jnp.pad(feat, ((0, 0), (0, 0), (0, m_pad - M), (0, 0)))

    # Group adjacent output slices so mid_ref stores are 128-lane aligned.
    if C % 128 == 0:
        group = 1
    elif 128 % C == 0 and WN % (128 // C) == 0:
        group = 128 // C
    else:
        group = 1   # TODO(synk): misaligned packing stores for this channel count

    grid = (B, m_pad // tm)
    flops = int(B * M * (2 * K * WN * C + 2 * WN * C * COUT))
    bytes_accessed = int(feat.size * 2 + wk.size * 2 + lin_w.size * 2
                         + B * m_pad * COUT * 2)
    block_bytes = tm * WK * 2 + K * tm * C * 2 + tm * COUT * 2
    scratch_bytes = tm * WN * C * 2 + tm * 128 * 4 * 2   # mid_ref + live f32 slices
    const_bytes = WN * C * COUT * 2 + COUT * 4

    out = pl.pallas_call(
        _make_pointconv_kernel(K, WN, C, COUT, group),
        out_shape=jax.ShapeDtypeStruct((B, m_pad, COUT), jnp.bfloat16),
        grid=grid,
        in_specs=[
            pl.BlockSpec((1, tm, WK), lambda b, t: (b, t, 0)),
            # TODO(synk): sweep pipeline_mode=pl.Buffered(3) on this stream once
            # profiled; default double-buffering kept for portability.
            pl.BlockSpec((1, K, tm, C), lambda b, t: (b, 0, t, 0)),
            pl.BlockSpec((WN * C, COUT), lambda b, t: (0, 0)),
            pl.BlockSpec((1, COUT), lambda b, t: (0, 0)),
        ],
        out_specs=pl.BlockSpec((1, tm, COUT), lambda b, t: (b, t, 0)),
        scratch_shapes=[pltpu.VMEM((tm, WN * C), jnp.bfloat16)],
        compiler_params=pltpu.CompilerParams(
            dimension_semantics=("parallel", "parallel"),
            vmem_limit_bytes=_vmem_limit(block_bytes, scratch_bytes, const_bytes)),
        cost_estimate=pl.CostEstimate(flops=flops, transcendentals=0,
                                      bytes_accessed=bytes_accessed),
    )(wk, feat, lin_w, lin_bf)
    return out[:, :M, :]


# ----------------------------------------------------------------------------
# Plain-JAX glue: kNN search + gather (data-dependent indexing), then Pallas.
# ----------------------------------------------------------------------------
def _knn_indices(input_xyz, query_xyz, k):
    """input_xyz: [B, N, 3], query_xyz: [B, M, 3] -> indices [B, M, k]."""
    # |q|^2 + |p|^2 - 2 q.p with the dot product forced to f32 so near-tie
    # neighbors are not reordered by a low-precision MXU pass.
    d2 = (jnp.sum(query_xyz ** 2, axis=-1, keepdims=True)
          + jnp.sum(input_xyz ** 2, axis=-1)[:, None, :]
          - 2.0 * jnp.einsum('bmd,bnd->bmn', query_xyz, input_xyz,
                             precision=jax.lax.Precision.HIGHEST))
    # TODO(synk): replace the exact O(B*M*N) top_k with a tiled/approximate
    # selection kernel; at realistic point counts it dominates wall-clock.
    _, idx = jax.lax.top_k(-d2, k)   # smallest squared distances
    return idx


def _gather_kmc(data_bnc, idx_bkm):
    # data: [B, N, C], idx: [B, K, M] -> [B, K, M, C]  (K-major layout)
    return jax.vmap(lambda d, i: d[i])(data_bnc, idx_bkm)


def pointconv(xyz_bcn, feat_bnc, new_xyz_bcm, conv_p, k):
    """xyz: [B,3,N] (NCW), feat: [B,N,C] (channels-last), new_xyz: [B,3,M]."""
    # TODO(synk): fuse this data-dependent gather into the Pallas kernel
    # (scalar-prefetched indices + manual DMA / in-kernel gather) to avoid
    # materializing the K-inflated knn_feat stream in HBM; per-row DMA
    # descriptor cost and SMEM index capacity make it a dedicated follow-up.
    B = xyz_bcn.shape[0]
    xyz = jnp.transpose(xyz_bcn, (0, 2, 1))          # [B, N, 3]
    new_xyz = jnp.transpose(new_xyz_bcm, (0, 2, 1))  # [B, M, 3]
    M = new_xyz.shape[1]
    idx = _knn_indices(xyz, new_xyz, k)              # [B, M, K]
    idx_t = jnp.transpose(idx, (0, 2, 1))            # [B, K, M]
    knn_xyz = _gather_kmc(xyz, idx_t)                # [B, K, M, 3]
    knn_feat = _gather_kmc(feat_bnc, idx_t)          # [B, K, M, C]
    rel = knn_xyz - new_xyz[:, None, :, :]           # [B, K, M, 3]

    # weight_net (1x1 Conv2d 3->WN + LeakyReLU) precomputed here so the kernel
    # stream is lane-dense [B, M, WN*K] instead of a 3-lane-wide coord block.
    wn = conv_p['wn_w'].shape[1]
    wk = jnp.einsum('bkmd,dw->bkmw', rel, conv_p['wn_w'],
                    precision=jax.lax.Precision.HIGHEST) + conv_p['wn_b'][0]
    wk = _leaky(wk)                                  # [B, K, M, WN]
    wk = jnp.transpose(wk, (0, 2, 3, 1)).reshape(B, M, wn * k)  # col = wi*K + kk

    return pointconv_aggregate(wk, knn_feat, conv_p['lin_w'], conv_p['lin_b'])


# ----------------------------------------------------------------------------
# Parameter init (deterministic, PyTorch-default-like uniform bounds)
# ----------------------------------------------------------------------------
def _uniform(key, shape, fan_in):
    bound = 1.0 / jnp.sqrt(jnp.float32(fan_in))
    return jax.random.uniform(key, shape, jnp.float32, -bound, bound)


def _init_mlp2(key, c_in, c_mid, c_out):
    k1, k2, k3, k4 = jax.random.split(key, 4)
    return {
        'w1': _uniform(k1, (c_in, c_mid), c_in),
        'b1': _uniform(k2, (1, c_mid), c_in),
        'w2': _uniform(k3, (c_mid, c_out), c_mid),
        'b2': _uniform(k4, (1, c_out), c_mid),
    }


def _init_pointconv(key, c_in, c_out):
    k1, k2, k3, k4 = jax.random.split(key, 4)
    return {
        'wn_w': _uniform(k1, (3, WN_DIM), 3),
        'wn_b': _uniform(k2, (1, WN_DIM), 3),
        # flat [WN*C, Cout] with row index w*C + c (matches torch .view order)
        'lin_w': _uniform(k3, (WN_DIM * c_in, c_out), WN_DIM * c_in),
        'lin_b': _uniform(k4, (1, c_out), WN_DIM * c_in),
    }


def init_encoder3d_params(key, n_channels):
    keys = jax.random.split(key, 1 + 2 * (len(n_channels) - 1))
    params = {'level0_mlp': _init_mlp2(keys[0], 3, n_channels[0], n_channels[0]),
              'mlps': [], 'convs': []}
    for i in range(len(n_channels) - 1):
        params['mlps'].append(
            _init_mlp2(keys[1 + 2 * i], n_channels[i], n_channels[i], n_channels[i + 1]))
        params['convs'].append(
            _init_pointconv(keys[2 + 2 * i], n_channels[i + 1], n_channels[i + 1]))
    return params


# ----------------------------------------------------------------------------
# Encoder3D forward
# ----------------------------------------------------------------------------
def encoder3d_forward(xyzs, params, k=16):
    """
    xyzs   : list of [B, 3, N_i]  (PyTorch NCW layout)
    returns: list of [B, C_i, N_i] feature pyramids (PyTorch NCW layout, f32)
    """
    assert len(xyzs) == len(params['mlps']) + 1
    # TODO(synk): norm != None (BatchNorm/InstanceNorm) branches are not implemented.
    x0 = jnp.transpose(xyzs[0], (0, 2, 1))                       # [B, N0, 3] f32
    p = params['level0_mlp']
    feats = [mlp1d_two_layer(x0, p['w1'], p['b1'], p['w2'], p['b2'])]
    for i in range(len(xyzs) - 1):
        p = params['mlps'][i]
        feat = mlp1d_two_layer(feats[-1], p['w1'], p['b1'], p['w2'], p['b2'])
        feat = pointconv(xyzs[i], feat, xyzs[i + 1], params['convs'][i], k)
        feats.append(feat)
    # back to NCW / f32 to match the PyTorch module's output convention
    return [jnp.transpose(f, (0, 2, 1)).astype(jnp.float32) for f in feats]


# ----------------------------------------------------------------------------
if __name__ == "__main__":
    key = jax.random.PRNGKey(0)
    k_pts, k_par = jax.random.split(key)

    B = 2
    n_channels = [16, 32, 64]
    knn_k = 8
    N0 = 64

    # point pyramid: level i+1 is a stride-2 subsample of level i
    xyz0 = jax.random.normal(k_pts, (B, 3, N0), jnp.float32)
    xyzs = [xyz0, xyz0[:, :, ::2], xyz0[:, :, ::4]]              # N = 64, 32, 16

    params = init_encoder3d_params(k_par, n_channels)
    feats = encoder3d_forward(xyzs, params, k=knn_k)
    feats = jax.block_until_ready(feats)

    expected = [(B, n_channels[i], xyzs[i].shape[-1]) for i in range(len(xyzs))]
    got = [tuple(f.shape) for f in feats]
    assert got == expected, (got, expected)
    assert all(bool(jnp.all(jnp.isfinite(f))) for f in feats)
    print("KERNEL_OK")
</pallas_src>

<mosaic_0001>
module attributes {stable_mosaic.version = 11 : i64} {
  func.func @kernel(%arg0: i32, %arg1: memref<128x3xf32, #tpu.memory_space<vmem>>, %arg2: memref<3x16xf32, #tpu.memory_space<vmem>>, %arg3: memref<1x16xf32, #tpu.memory_space<vmem>>, %arg4: memref<16x16xbf16, #tpu.memory_space<vmem>>, %arg5: memref<1x16xf32, #tpu.memory_space<vmem>>, %arg6: memref<128x16xbf16, #tpu.memory_space<vmem>>) attributes {dimension_semantics = [#tpu.dimension_semantics<parallel>], iteration_bounds = array<i64: 1>, scalar_prefetch = 0 : i64, scratch_operands = 0 : i64, tpu.core_type = #tpu.core_type<tc>, window_params = [{transform_indices = @transform_0, window_bounds = array<i64: 128, 3>}, {pipeline_mode = #tpu.pipeline_mode<synchronous>, transform_indices = @transform_1, window_bounds = array<i64: 3, 16>}, {pipeline_mode = #tpu.pipeline_mode<synchronous>, transform_indices = @transform_2, window_bounds = array<i64: 1, 16>}, {pipeline_mode = #tpu.pipeline_mode<synchronous>, transform_indices = @transform_3, window_bounds = array<i64: 16, 16>}, {pipeline_mode = #tpu.pipeline_mode<synchronous>, transform_indices = @transform_4, window_bounds = array<i64: 1, 16>}, {transform_indices = @transform_5, window_bounds = array<i64: 128, 16>}]} {
    %c0 = arith.constant 0 : index
    %c0_0 = arith.constant 0 : index
    %0 = vector.load %arg1[%c0, %c0_0] : memref<128x3xf32, #tpu.memory_space<vmem>>, vector<128x3xf32>
    %c0_1 = arith.constant 0 : index
    %c0_2 = arith.constant 0 : index
    %1 = vector.load %arg3[%c0_1, %c0_2] : memref<1x16xf32, #tpu.memory_space<vmem>>, vector<1x16xf32>
    %c0_3 = arith.constant 0 : index
    %c0_4 = arith.constant 0 : index
    %2 = vector.load %arg2[%c0_3, %c0_4] : memref<3x16xf32, #tpu.memory_space<vmem>>, vector<3x16xf32>
    %3 = vector.extract_strided_slice %0 {offsets = [0, 0], sizes = [128, 1], strides = [1, 1]} : vector<128x3xf32> to vector<128x1xf32>
    %4 = vector.extract_strided_slice %2 {offsets = [0, 0], sizes = [1, 16], strides = [1, 1]} : vector<3x16xf32> to vector<1x16xf32>
    %5 = vector.broadcast %3 : vector<128x1xf32> to vector<128x16xf32>
    %6 = vector.broadcast %4 : vector<1x16xf32> to vector<128x16xf32>
    %7 = arith.mulf %5, %6 : vector<128x16xf32>
    %8 = vector.broadcast %1 : vector<1x16xf32> to vector<128x16xf32>
    %9 = arith.addf %8, %7 : vector<128x16xf32>
    %10 = vector.extract_strided_slice %0 {offsets = [0, 1], sizes = [128, 1], strides = [1, 1]} : vector<128x3xf32> to vector<128x1xf32>
    %11 = vector.extract_strided_slice %2 {offsets = [1, 0], sizes = [1, 16], strides = [1, 1]} : vector<3x16xf32> to vector<1x16xf32>
    %12 = vector.broadcast %10 : vector<128x1xf32> to vector<128x16xf32>
    %13 = vector.broadcast %11 : vector<1x16xf32> to vector<128x16xf32>
    %14 = arith.mulf %12, %13 : vector<128x16xf32>
    %15 = arith.addf %9, %14 : vector<128x16xf32>
    %16 = vector.extract_strided_slice %0 {offsets = [0, 2], sizes = [128, 1], strides = [1, 1]} : vector<128x3xf32> to vector<128x1xf32>
    %17 = vector.extract_strided_slice %2 {offsets = [2, 0], sizes = [1, 16], strides = [1, 1]} : vector<3x16xf32> to vector<1x16xf32>
    %18 = vector.broadcast %16 : vector<128x1xf32> to vector<128x16xf32>
    %19 = vector.broadcast %17 : vector<1x16xf32> to vector<128x16xf32>
    %20 = arith.mulf %18, %19 : vector<128x16xf32>
    %21 = arith.addf %15, %20 : vector<128x16xf32>
    %cst = arith.constant 0.000000e+00 : f32
    %22 = vector.broadcast %cst : f32 to vector<128x16xf32>
    %23 = arith.cmpf oge, %21, %22 : vector<128x16xf32>
    %cst_5 = arith.constant 1.000000e-01 : f32
    %24 = vector.broadcast %cst_5 : f32 to vector<128x16xf32>
    %25 = arith.mulf %24, %21 : vector<128x16xf32>
    %26 = arith.select %23, %21, %25 : vector<128x16xi1>, vector<128x16xf32>
    %27 = arith.truncf %26 : vector<128x16xf32> to vector<128x16xbf16>
    %c0_6 = arith.constant 0 : index
    %c0_7 = arith.constant 0 : index
    %28 = vector.load %arg4[%c0_6, %c0_7] : memref<16x16xbf16, #tpu.memory_space<vmem>>, vector<16x16xbf16>
    %cst_8 = arith.constant dense<0.000000e+00> : vector<128x16xf32>
    %29 = tpu.matmul %27, %28, %cst_8 {dimension_numbers = #tpu.dot_dimension_numbers<[1], [0], [0], [1], [0, 0, 1, 1], [], []>} : vector<128x16xbf16>, vector<16x16xbf16>, vector<128x16xf32> -> vector<128x16xf32>
    %c0_9 = arith.constant 0 : index
    %c0_10 = arith.constant 0 : index
    %30 = vector.load %arg5[%c0_9, %c0_10] : memref<1x16xf32, #tpu.memory_space<vmem>>, vector<1x16xf32>
    %31 = vector.broadcast %30 : vector<1x16xf32> to vector<128x16xf32>
    %32 = arith.addf %29, %31 : vector<128x16xf32>
    %cst_11 = arith.constant 0.000000e+00 : f32
    %33 = vector.broadcast %cst_11 : f32 to vector<128x16xf32>
    %34 = arith.cmpf oge, %32, %33 : vector<128x16xf32>
    %cst_12 = arith.constant 1.000000e-01 : f32
    %35 = vector.broadcast %cst_12 : f32 to vector<128x16xf32>
    %36 = arith.mulf %35, %32 : vector<128x16xf32>
    %37 = arith.select %34, %32, %36 : vector<128x16xi1>, vector<128x16xf32>
    %38 = arith.truncf %37 : vector<128x16xf32> to vector<128x16xbf16>
    %c0_13 = arith.constant 0 : index
    %c0_14 = arith.constant 0 : index
    %39 = vector.load %arg6[%c0_13, %c0_14] : memref<128x16xbf16, #tpu.memory_space<vmem>>, vector<128x16xbf16>
    tpu.vector_store %arg6[%c0_13, %c0_14], %38 {strides = array<i32>} : memref<128x16xbf16, #tpu.memory_space<vmem>>, vector<128x16xbf16>,
    return
  }
  func.func @transform_0(%arg0: i32) -> (i32, i32) {
    %c0_i32 = arith.constant 0 : i32
    %c0_i32_0 = arith.constant 0 : i32
    return %arg0, %c0_i32 : i32, i32
  }
  func.func @transform_1(%arg0: i32) -> (i32, i32) {
    %c0_i32 = arith.constant 0 : i32
    %c0_i32_0 = arith.constant 0 : i32
    %c0_i32_1 = arith.constant 0 : i32
    return %c0_i32, %c0_i32_0 : i32, i32
  }
  func.func @transform_2(%arg0: i32) -> (i32, i32) {
    %c0_i32 = arith.constant 0 : i32
    %c0_i32_0 = arith.constant 0 : i32
    %c0_i32_1 = arith.constant 0 : i32
    return %c0_i32, %c0_i32_0 : i32, i32
  }
  func.func @transform_3(%arg0: i32) -> (i32, i32) {
    %c0_i32 = arith.constant 0 : i32
    %c0_i32_0 = arith.constant 0 : i32
    %c0_i32_1 = arith.constant 0 : i32
    return %c0_i32, %c0_i32_0 : i32, i32
  }
  func.func @transform_4(%arg0: i32) -> (i32, i32) {
    %c0_i32 = arith.constant 0 : i32
    %c0_i32_0 = arith.constant 0 : i32
    %c0_i32_1 = arith.constant 0 : i32
    return %c0_i32, %c0_i32_0 : i32, i32
  }
  func.func @transform_5(%arg0: i32) -> (i32, i32) {
    %c0_i32 = arith.constant 0 : i32
    %c0_i32_0 = arith.constant 0 : i32
    return %arg0, %c0_i32 : i32, i32
  }
}

</mosaic_0001>

<bundles_post_ra>
// kernel: tpu_custom_call.1
= control target key start
LH: loop header
LB: loop body
LE: loop exit
PB: predicated region body
PF: predicated region fallthrough
CT: control target
= control target key end

     0   :  { %v772_v0 = vmov 0   ;;  %v773_v10 = vmov 1   ;;  %v774_v14 = vmov 2   ;;  %v119_v28 = vlaneseq  ;;  %s1072_s0 = inlined_call_operand.vmem [shape: f32[128,3], index: 0, kind: input, shape index: {}]   ;;  %s1073_s3 = inlined_call_operand.vmem [shape: bf16[16,16], index: 3, kind: input, shape index: {}]   ;;  %s1074_s1 = inlined_call_operand.vmem [shape: f32[3,16], index: 1, kind: input, shape index: {}]   ;;  %s1075_s2 = inlined_call_operand.vmem [shape: f32[1,16], index: 2, kind: input, shape index: {}]   ;;  %s1076_s4 = inlined_call_operand.vmem [shape: f32[1,16], index: 4, kind: input, shape index: {}]   ;;  %s1077_s5 = inlined_call_operand.vmem [shape: bf16[128,16], index: 5, kind: output, shape index: {}]  }
   0x1   :  { %763 = vset.pattern.permute.xlu1 %v772_v0  ;;  %762 = vset.pattern.permute.xlu0 %v772_v0  ;;  %v29_v1 = vld [vmem:[%s1072_s0 + $0x40] sm:$0xff]  ;;  %v30_v3 = vld [vmem:[%s1072_s0 + $0x48] sm:$0xff]  ;;  %v24_v5 = vld [vmem:[%s1072_s0 + $0x18] sm:$0xff]  ;;  %vm432_vm2 = vcmask 130048  }
   0x2   :  { %v21_v2 = vld [vmem:[%s1072_s0] sm:$0xff]  ;;  %81 = vperm.xlu1 %763, %v29_v1   ;;  %v22_v4 = vld [vmem:[%s1072_s0 + $0x8] sm:$0xff]  ;;  %v23_v6 = vld [vmem:[%s1072_s0 + $0x10] sm:$0xff]  ;;  %v120_v31 = vshrl.u32 %v119_v28, 7 }
   0x3   :  { %41 = vperm.xlu0 %762, %v21_v2   ;;  %v32_v7 = vld [vmem:[%s1072_s0 + $0x58] sm:$0xff]  ;;  %v31_v8 = vld [vmem:[%s1072_s0 + $0x50] sm:$0xff]  ;;  %v25_v9 = vld [vmem:[%s1072_s0 + $0x20] sm:$0xff] }
   0x4   :  { %v34_v11 = vld [vmem:[%s1072_s0 + $0x68] sm:$0xff]  ;;  %v28_v12 = vld [vmem:[%s1072_s0 + $0x38] sm:$0xff]  ;;  %v27_v16 = vld [vmem:[%s1072_s0 + $0x30] sm:$0xff]  ;;  %v121_v34 = vsub.s32 0, %v120_v31  ;;  %v227_v40 = vsub.s32 1, %v120_v31  ;;  %v327_v46 = vsub.s32 2, %v120_v31 }
   0x5   :  { %v36_v13 = vld [vmem:[%s1072_s0 + $0x78] sm:$0xff]  ;;  %v26_v15 = vld [vmem:[%s1072_s0 + $0x28] sm:$0xff]  ;;  %v35_v17 = vld [vmem:[%s1072_s0 + $0x70] sm:$0xff] }
   0x6   :  { %86 = vperm.xlu1 %763, %v30_v3   ;;  %v33_v18 = vld [vmem:[%s1072_s0 + $0x60] sm:$0xff] }
   0x7   :  { %46 = vperm.xlu0 %762, %v22_v4   ;;  %v771_v19 = vld [vmem:[%s1073_s3] sm:$0xff]  }
   0x8   :  { %739 = vmatprep.subr.bf16.mxu0 %v771_v19  ;;  %757 = vmatprep.subr.bf16.mxu1 %v771_v19  ;;  %v38_v35 = vld [vmem:[%s1074_s1] sm:$0x7] }
   0x9   :  { %740 = vmatpush3.bf16.msra.mxu0 %v771_v19  ;;  %758 = vmatpush3.bf16.msra.mxu1 %v771_v19  ;;  %v873_v38 = vrot.slane %v38_v35, %v121_v34  ;;  %v881_v44 = vrot.slane %v38_v35, %v227_v40  ;;  %v886_v47 = vld [vmem:[%s1075_s2] ss:$0 sm:$0xff]  ;;  %v891_v52 = vrot.slane %v38_v35, %v327_v46 }
   0xa   :  { %56 = vperm.xlu1 %763, %v24_v5  }
   0xb   :  { %51 = vperm.xlu0 %762, %v23_v6  }
   0xe   :  { %96 = vperm.xlu1 %763, %v32_v7  }
   0xf   :  { %91 = vperm.xlu0 %762, %v31_v8  }
  0x12   :  { %764 = vset.pattern.permute.xlu1 %v773_v10 }
  0x13   :  { %61 = vperm.xlu0 %762, %v25_v9   ;;  %166 = vperm.xlu1 %764, %v22_v4  }
  0x17   :  { %106 = vperm.xlu0 %762, %v34_v11   ;;  %194 = vperm.xlu1 %764, %v29_v1  }
  0x1b   :  { %76 = vperm.xlu0 %762, %v28_v12   ;;  %170 = vperm.xlu1 %764, %v23_v6  }
  0x1f   :  { %116 = vperm.xlu0 %762, %v36_v13   ;;  %202 = vperm.xlu1 %764, %v31_v8  }
  0x23   :  { %767 = vset.pattern.permute.xlu0 %v773_v10  ;;  %765 = vset.pattern.permute.xlu1 %v774_v14 }
  0x24   :  { %162 = vperm.xlu0 %767, %v21_v2   ;;  %262 = vperm.xlu1 %765, %v21_v2  }
  0x28   :  { %198 = vperm.xlu0 %767, %v30_v3   ;;  %294 = vperm.xlu1 %765, %v29_v1  }
  0x2c   :  { %174 = vperm.xlu0 %767, %v24_v5   ;;  %298 = vperm.xlu1 %765, %v30_v3  }
  0x30   :  { %206 = vperm.xlu0 %767, %v32_v7   ;;  %274 = vperm.xlu1 %765, %v24_v5  }
  0x34   :  { %182 = vperm.xlu0 %767, %v26_v15   ;;  %306 = vperm.xlu1 %765, %v32_v7  }
  0x38   :  { %186 = vperm.xlu0 %767, %v27_v16   ;;  %766 = vset.pattern.permute.xlu1 %v772_v0 }
  0x39   :  { %66 = vperm.xlu1 %766, %v26_v15  }
  0x3c   :  { %218 = vperm.xlu0 %767, %v35_v17  }
  0x3d   :  { %101 = vperm.xlu1 %766, %v33_v18  }
  0x40   :  { %769 = vset.pattern.permute.xlu0 %v774_v14 }
  0x41   :  { %266 = vperm.xlu0 %769, %v22_v4   ;;  %71 = vperm.xlu1 %766, %v27_v16  }
  0x45   :  { %270 = vperm.xlu0 %769, %v23_v6   ;;  %111 = vperm.xlu1 %766, %v35_v17  }
  0x49   :  { %302 = vperm.xlu0 %769, %v31_v8   ;;  %768 = vset.pattern.permute.xlu1 %v773_v10 }
  0x4a   :  { %178 = vperm.xlu1 %768, %v25_v9  }
  0x4d   :  { %278 = vperm.xlu0 %769, %v25_v9  }
  0x4e   :  { %210 = vperm.xlu1 %768, %v33_v18  }
  0x51   :  { %314 = vperm.xlu0 %769, %v34_v11  }
  0x52   :  { %214 = vperm.xlu1 %768, %v34_v11  }
  0x55   :  { %290 = vperm.xlu0 %769, %v28_v12  }
  0x56   :  { %190 = vperm.xlu1 %768, %v28_v12  }
  0x59   :  { %322 = vperm.xlu0 %769, %v36_v13  }
  0x5a   :  { %222 = vperm.xlu1 %768, %v36_v13  }
  0x5e   :  { %770 = vset.pattern.permute.xlu1 %v774_v14 }
  0x5f   :  { %282 = vperm.xlu1 %770, %v26_v15  }
  0x63   :  { %310 = vperm.xlu1 %770, %v33_v18  }
  0x67   :  { %286 = vperm.xlu1 %770, %v27_v16  }
  0x6b   :  { %318 = vperm.xlu1 %770, %v35_v17  }
  0x7d   :  { %v82_v20 = vpop.permute.xlu1 %81 }
  0x7e   :  { %v42_v21 = vpop.permute.xlu0 %41  ;;  %v131_v43 = vmul.f32 %v873_v38, %v82_v20 }
  0x7f   :  { %v123_v8 = vmul.f32 %v873_v38, %v42_v21 }
  0x80   :  { %v153_v50 = vadd.f32 %v886_v47, %v131_v43 }
  0x81   :  { %v87_v22 = vpop.permute.xlu1 %86  ;;  %v145_v13 = vadd.f32 %v886_v47, %v123_v8 }
  0x82   :  { %v47_v23 = vpop.permute.xlu0 %46  ;;  %v132_v51 = vmul.f32 %v873_v38, %v87_v22 }
  0x83   :  { %v124_v14 = vmul.f32 %v873_v38, %v47_v23 }
  0x84   :  { %v154_v58 = vadd.f32 %v886_v47, %v132_v51 }
  0x85   :  { %v856_v24 = vpop.permute.xlu1 %56  ;;  %v146_v20 = vadd.f32 %v886_v47, %v124_v14 }
  0x86   :  { %v858_v25 = vpop.permute.xlu0 %51  ;;  %v126_v18 = vmul.f32 %v873_v38, %v856_v24 }
  0x87   :  { %v125_v23 = vmul.f32 %v873_v38, %v858_v25 }
  0x88   :  { %v148_v34 = vadd.f32 %v886_v47, %v126_v18 }
  0x89   :  { %v860_v26 = vpop.permute.xlu1 %96  ;;  %v147_v25 = vadd.f32 %v886_v47, %v125_v23 }
  0x8a   :  { %v862_v27 = vpop.permute.xlu0 %91  ;;  %v134_v31 = vmul.f32 %v873_v38, %v860_v26 }
  0x8c   :  { %v156_v26 = vadd.f32 %v886_v47, %v134_v31 }
  0x8e   :  { %v864_v29 = vpop.permute.xlu0 %61  ;;  %v167_v30 = vpop.permute.xlu1 %166 }
  0x8f   :  { %v230_v21 = vmul.f32 %v881_v44, %v167_v30 }
  0x91   :  { %v246_v40 = vadd.f32 %v230_v21, %v146_v20 }
  0x92   :  { %v866_v32 = vpop.permute.xlu0 %106  ;;  %v195_v33 = vpop.permute.xlu1 %194 }
  0x93   :  { %v237_v49 = vmul.f32 %v881_v44, %v195_v33 }
  0x95   :  { %v253_v55 = vadd.f32 %v237_v49, %v153_v50 }
  0x96   :  { %v871_v36 = vpop.permute.xlu0 %76  ;;  %v171_v37 = vpop.permute.xlu1 %170 }
  0x97   :  { %v231_v35 = vmul.f32 %v881_v44, %v171_v37 }
  0x9a   :  { %v117_v39 = vpop.permute.xlu0 %116  ;;  %v878_v42 = vpop.permute.xlu1 %202 }
  0x9b   :  { %v876_v41 = vmul.f32 %v873_v38, %v117_v39 }
  0x9f   :  { %v163_v45 = vpop.permute.xlu0 %162  ;;  %v263_v48 = vpop.permute.xlu1 %262 }
  0xa0   :  { %v229_v11 = vmul.f32 %v881_v44, %v163_v45  ;;  %v329_v17 = vmul.f32 %v891_v52, %v263_v48  ;;  %v133_v48 = vmul.f32 %v873_v38, %v862_v27 }
  0xa2   :  { %v245_v16 = vadd.f32 %v229_v11, %v145_v13 }
  0xa3   :  { %v199_v53 = vpop.permute.xlu0 %198  ;;  %v295_v54 = vpop.permute.xlu1 %294 }
  0xa4   :  { %v238_v56 = vmul.f32 %v881_v44, %v199_v53  ;;  %v337_v57 = vmul.f32 %v891_v52, %v295_v54  ;;  %v345_v33 = vadd.f32 %v329_v17, %v245_v16  ;;  %v247_v53 = vadd.f32 %v231_v35, %v147_v25 }
  0xa5   :  { %v239_v54 = vmul.f32 %v881_v44, %v878_v42 }
  0xa6   :  { %v353_v59 = vadd.f32 %v337_v57, %v253_v55  ;;  %v254_v62 = vadd.f32 %v238_v56, %v154_v58  ;;  %v377_v49 = vmul.f32 0.1, %v345_v33  ;;  %vm361_vm3 = vcmp.ge.f32.partialorder %v345_v33, 0.0 }
  0xa7   :  { %v175_v60 = vpop.permute.xlu0 %174  ;;  %v299_v61 = vpop.permute.xlu1 %298 }
  0xa8   :  { %v338_v63 = vmul.f32 %v891_v52, %v299_v61  ;;  %v385_v2 = vmul.f32 0.1, %v353_v59  ;;  %vm369_vm0 = vcmp.ge.f32.partialorder %v353_v59, 0.0  ;;  %v232_v22 = vmul.f32 %v881_v44, %v175_v60 }
  0xa9   :  { %v155_v60 = vadd.f32 %v886_v47, %v133_v48  ;;  %v393_v61 = vsel %vm361_vm3, %v345_v33, %v377_v49  ;;  %vm666_vm3 = vcmask 125952  }
  0xaa   :  { %v354_v0 = vadd.f32 %v338_v63, %v254_v62  ;;  %v401_v6 = vsel %vm369_vm0, %v353_v59, %v385_v2  ;;  %v248_v30 = vadd.f32 %v232_v22, %v148_v34  ;;  %v127_v34 = vmul.f32 %v873_v38, %v864_v29 }
  0xab   :  { %v207_v1 = vpop.permute.xlu0 %206  ;;  %v275_v3 = vpop.permute.xlu1 %274  ;;  %v160_v29 = vadd.f32 %v886_v47, %v876_v41 }
  0xac   :  { %vm370_vm1 = vcmp.ge.f32.partialorder %v354_v0, 0.0  ;;  %v386_v4 = vmul.f32 0.1, %v354_v0  ;;  %v332_v24 = vmul.f32 %v891_v52, %v275_v3  ;;  %v240_v43 = vmul.f32 %v881_v44, %v207_v1 }
  0xae   :  { %v402_v7 = vsel %vm370_vm1, %v354_v0, %v386_v4  ;;  %v348_v50 = vadd.f32 %v332_v24, %v248_v30  ;;  %v256_v56 = vadd.f32 %v240_v43, %v156_v26  ;;  %v136_v30 = vmul.f32 %v873_v38, %v866_v32 }
  0xaf   :  { %v897_v5 = vpop.permute.xlu0 %182  ;;  %v307_v9 = vpop.permute.xlu1 %306  ;;  %v413_v10 = vpack.c.bf16 %v402_v7, %v401_v6  ;;  %v255_v6 = vadd.f32 %v239_v54, %v155_v60  ;;  %v130_v32 = vmul.f32 %v873_v38, %v871_v36 }
  0xb0   :  { %v340_v37 = vmul.f32 %v891_v52, %v307_v9  ;;  %v380_v62 = vmul.f32 0.1, %v348_v50  ;;  %vm364_vm5 = vcmp.ge.f32.partialorder %v348_v50, 0.0 }
  0xb1   :  { %749 = vmatprep.mubr.msk.bf16.mxu1 %vm432_vm2, %v413_v10 }
  0xb2   :  { %v356_v63 = vadd.f32 %v340_v37, %v256_v56  ;;  %v396_v11 = vsel %vm364_vm5, %v348_v50, %v380_v62  ;;  %v158_v37 = vadd.f32 %v886_v47, %v136_v30  ;;  %v234_v56 = vmul.f32 %v881_v44, %v897_v5 }
  0xb3   :  { %v902_v12 = vpop.permute.xlu0 %186 }
  0xb4   :  { %v906_v15 = vpop.permute.xlu1 %66  ;;  %v388_v13 = vmul.f32 0.1, %v356_v63  ;;  %vm372_vm7 = vcmp.ge.f32.partialorder %v356_v63, 0.0 }
  0xb5   :  { %v128_v43 = vmul.f32 %v873_v38, %v906_v15 }
  0xb6   :  { %v404_v21 = vsel %vm372_vm7, %v356_v63, %v388_v13 }
  0xb7   :  { %v219_v19 = vpop.permute.xlu0 %218 }
  0xb8   :  { %v914_v28 = vpop.permute.xlu1 %101  ;;  %v243_v2 = vmul.f32 %v881_v44, %v219_v19 }
  0xb9   :  { %v135_v15 = vmul.f32 %v873_v38, %v914_v28  ;;  %v152_v28 = vadd.f32 %v886_v47, %v130_v32 }
  0xbb   :  { %v157_v63 = vadd.f32 %v886_v47, %v135_v15 }
  0xbc   :  { %v267_v39 = vpop.permute.xlu0 %266  ;;  %v925_v46 = vpop.permute.xlu1 %71 }
  0xbd   :  { %v330_v45 = vmul.f32 %v891_v52, %v267_v39  ;;  %v129_v36 = vmul.f32 %v873_v38, %v925_v46 }
  0xbf   :  { %v346_v51 = vadd.f32 %v330_v45, %v246_v40  ;;  %v149_v40 = vadd.f32 %v886_v47, %v127_v34 }
  0xc0   :  { %v271_v55 = vpop.permute.xlu0 %270  ;;  %v112_v58 = vpop.permute.xlu1 %111 }
  0xc1   :  { %v331_v57 = vmul.f32 %v891_v52, %v271_v55  ;;  %vm362_vm4 = vcmp.ge.f32.partialorder %v346_v51, 0.0  ;;  %v378_v59 = vmul.f32 0.1, %v346_v51  ;;  %v137_v27 = vmul.f32 %v873_v38, %v112_v58 }
  0xc3   :  { %v347_v0 = vadd.f32 %v331_v57, %v247_v53  ;;  %v394_v1 = vsel %vm362_vm4, %v346_v51, %v378_v59  ;;  %v159_v42 = vadd.f32 %v886_v47, %v137_v27  ;;  %v150_v51 = vadd.f32 %v886_v47, %v128_v43 }
  0xc4   :  { %v303_v3 = vpop.permute.xlu0 %302  ;;  %v409_v4 = vpack.c.bf16 %v394_v1, %v393_v61 }
  0xc5   :  { %vm363_vm6 = vcmp.ge.f32.partialorder %v347_v0, 0.0  ;;  %v379_v7 = vmul.f32 0.1, %v347_v0  ;;  %v339_v8 = vmul.f32 %v891_v52, %v303_v3  ;;  %v179_v9 = vpop.permute.xlu1 %178  ;;  %v941_v10 = vadd.f32 %v243_v2, %v159_v42 }
  0xc6   :  { %741 = vmatprep.mubr.msk.bf16.mxu0 %vm432_vm2, %v409_v4  ;;  %v233_v35 = vmul.f32 %v881_v44, %v179_v9  ;;  %v250_v61 = vadd.f32 %v234_v56, %v150_v51  ;;  %v151_v42 = vadd.f32 %v886_v47, %v129_v36 }
  0xc7   :  { %v395_v14 = vsel %vm363_vm6, %v347_v0, %v379_v7  ;;  %v355_v16 = vadd.f32 %v339_v8, %v255_v6  ;;  %v235_v7 = vmul.f32 %v881_v44, %v902_v12 }
  0xc8   :  { %v279_v17 = vpop.permute.xlu0 %278  ;;  %v410_v18 = vpack.c.bf16 %v396_v11, %v395_v14  ;;  %v249_v45 = vadd.f32 %v233_v35, %v149_v40 }
  0xc9   :  { %vm371_vm8 = vcmp.ge.f32.partialorder %v355_v16, 0.0  ;;  %v387_v19 = vmul.f32 0.1, %v355_v16  ;;  %v211_v20 = vpop.permute.xlu1 %210  ;;  %v333_v25 = vmul.f32 %v891_v52, %v279_v17 }
  0xca   :  { %742 = vmatmul.mubr.msk.bf16.vlgmr.msra.gmra.mxu0 %vm432_vm2, %v410_v18  ;;  %v241_v59 = vmul.f32 %v881_v44, %v211_v20  ;;  %v251_v18 = vadd.f32 %v235_v7, %v151_v42 }
  0xcb   :  { %v403_v22 = vsel %vm371_vm8, %v355_v16, %v387_v19  ;;  %v349_v53 = vadd.f32 %v333_v25, %v249_v45 }
  0xcc   :  { %v315_v23 = vpop.permute.xlu0 %314  ;;  %v414_v31 = vpack.c.bf16 %v404_v21, %v403_v22  ;;  %v257_v3 = vadd.f32 %v241_v59, %v157_v63 }
  0xcd   :  { %v215_v33 = vpop.permute.xlu1 %214  ;;  %v342_v41 = vmul.f32 %v891_v52, %v315_v23  ;;  %v381_v5 = vmul.f32 0.1, %v349_v53  ;;  %vm365_vm9 = vcmp.ge.f32.partialorder %v349_v53, 0.0 }
  0xce   :  { %750 = vmatmul.mubr.msk.bf16.vlgmr.msra.gmra.mxu1 %vm432_vm2, %v414_v31  ;;  %v242_v26 = vmul.f32 %v881_v44, %v215_v33 }
  0xcf   :  { %v397_v8 = vsel %vm365_vm9, %v349_v53, %v381_v5 }
  0xd0   :  { %v291_v24 = vpop.permute.xlu0 %290  ;;  %v258_v57 = vadd.f32 %v242_v26, %v158_v37 }
  0xd1   :  { %v191_v39 = vpop.permute.xlu1 %190  ;;  %v336_v46 = vmul.f32 %v891_v52, %v291_v24 }
  0xd2   :  { %v236_v58 = vmul.f32 %v881_v44, %v191_v39  ;;  %v358_v0 = vadd.f32 %v342_v41, %v258_v57 }
  0xd4   :  { %v323_v48 = vpop.permute.xlu0 %322  ;;  %v252_v1 = vadd.f32 %v236_v58, %v152_v28  ;;  %v390_v9 = vmul.f32 0.1, %v358_v0  ;;  %vm374_vm11 = vcmp.ge.f32.partialorder %v358_v0, 0.0 }
  0xd5   :  { %v223_v49 = vpop.permute.xlu1 %222  ;;  %v344_v54 = vmul.f32 %v891_v52, %v323_v48 }
  0xd6   :  { %v244_v50 = vmul.f32 %v881_v44, %v223_v49  ;;  %v352_v11 = vadd.f32 %v336_v46, %v252_v1  ;;  %v406_v23 = vsel %vm374_vm11, %v358_v0, %v390_v9 }
  0xd8   :  { %v260_v55 = vadd.f32 %v244_v50, %v160_v29  ;;  %v384_v20 = vmul.f32 0.1, %v352_v11  ;;  %vm368_vm13 = vcmp.ge.f32.partialorder %v352_v11, 0.0 }
  0xda   :  { %v360_v60 = vadd.f32 %v344_v54, %v260_v55  ;;  %v283_v27 = vpop.permute.xlu1 %282  ;;  %v400_v39 = vsel %vm368_vm13, %v352_v11, %v384_v20 }
  0xdb   :  { %v334_v62 = vmul.f32 %v891_v52, %v283_v27 }
  0xdc   :  { %v392_v34 = vmul.f32 0.1, %v360_v60  ;;  %vm376_vm15 = vcmp.ge.f32.partialorder %v360_v60, 0.0 }
  0xdd   :  { %v350_v2 = vadd.f32 %v334_v62, %v250_v61 }
  0xde   :  { %v311_v38 = vpop.permute.xlu1 %310  ;;  %v408_v45 = vsel %vm376_vm15, %v360_v60, %v392_v34 }
  0xdf   :  { %vm366_vm10 = vcmp.ge.f32.partialorder %v350_v2, 0.0  ;;  %v382_v4 = vmul.f32 0.1, %v350_v2  ;;  %v341_v6 = vmul.f32 %v891_v52, %v311_v38 }
  0xe1   :  { %v398_v13 = vsel %vm366_vm10, %v350_v2, %v382_v4  ;;  %v357_v14 = vadd.f32 %v341_v6, %v257_v3 }
  0xe2   :  { %v287_v16 = vpop.permute.xlu1 %286  ;;  %v411_v17 = vpack.c.bf16 %v398_v13, %v397_v8 }
  0xe3   :  { %vm373_vm12 = vcmp.ge.f32.partialorder %v357_v14, 0.0  ;;  %v389_v47 = vmul.f32 0.1, %v357_v14  ;;  %v335_v19 = vmul.f32 %v891_v52, %v287_v16 }
  0xe4   :  { %745 = vmatprep.mubr.msk.bf16.mxu0 %vm432_vm2, %v411_v17 }
  0xe5   :  { %v405_v21 = vsel %vm373_vm12, %v357_v14, %v389_v47  ;;  %v351_v22 = vadd.f32 %v335_v19, %v251_v18 }
  0xe6   :  { %v319_v44 = vpop.permute.xlu1 %318  ;;  %v415_v12 = vpack.c.bf16 %v406_v23, %v405_v21 }
  0xe7   :  { %vm367_vm14 = vcmp.ge.f32.partialorder %v351_v22, 0.0  ;;  %v383_v31 = vmul.f32 0.1, %v351_v22  ;;  %v343_v33 = vmul.f32 %v891_v52, %v319_v44  ;;  %v990_v52 = vld [vmem:[%s1076_s4] ss:$0 sm:$0xff] }
  0xe8   :  { %753 = vmatprep.mubr.msk.bf16.mxu1 %vm432_vm2, %v415_v12 }
  0xe9   :  { %v399_v24 = vsel %vm367_vm14, %v351_v22, %v383_v31  ;;  %v359_v35 = vadd.f32 %v343_v33, %v941_v10 }
  0xea   :  { %v412_v40 = vpack.c.bf16 %v400_v39, %v399_v24 }
  0xeb   :  { %vm375_vm0 = vcmp.ge.f32.partialorder %v359_v35, 0.0  ;;  %v391_v30 = vmul.f32 0.1, %v359_v35 }
  0xec   :  { %746 = vmatmul.mubr.msk.bf16.gmra.mxu0 %vm432_vm2, %v412_v40 }
  0xed   :  { %v407_v43 = vsel %vm375_vm0, %v359_v35, %v391_v30 }
  0xee   :  { %v416_v25 = vpack.c.bf16 %v408_v45, %v407_v43 }
  0xf0   :  { %754 = vmatmul.mubr.msk.bf16.gmra.mxu1 %vm432_vm2, %v416_v25 }
 0x18a   :  { %v743_v26 = vpop.f32.mrf.mxu0 }
 0x18b   :  { %v500_v10 = vadd.f32 %v743_v26, %v990_v52 }
 0x18c   :  { %v491_v48 = vpop.f32.mrf.mxu0 }
 0x18d   :  { %vm556_vm1 = vcmp.ge.f32.partialorder %v500_v10, 0.0  ;;  %v572_v49 = vmul.f32 0.1, %v500_v10  ;;  %v492_v29 = vadd.f32 %v990_v52, %v491_v48 }
 0x18e   :  { %v744_v50 = vpop.f32.mrf.mxu0  ;;  %v751_v37 = vpop.f32.mrf.mxu1 }
 0x18f   :  { %v588_v32 = vsel %vm556_vm1, %v500_v10, %v572_v49  ;;  %vm554_vm4 = vcmp.ge.f32.partialorder %v492_v29, 0.0  ;;  %v570_v51 = vmul.f32 0.1, %v492_v29  ;;  %v503_v15 = vadd.f32 %v744_v50, %v990_v52 }
 0x190   :  { %v716_v53 = vpack.c.bf16 %v588_v32, %v588_v32  ;;  %v532_v54 = vadd.f32 %v751_v37, %v990_v52  ;;  %v494_v55 = vpop.f32.mrf.mxu0  ;;  %v523_v56 = vpop.f32.mrf.mxu1 }
 0x191   :  { %v586_v41 = vsel %vm554_vm4, %v492_v29, %v570_v51  ;;  %vm557_vm2 = vcmp.ge.f32.partialorder %v503_v15, 0.0  ;;  %v573_v57 = vmul.f32 0.1, %v503_v15  ;;  %v495_v58 = vadd.f32 %v990_v52, %v494_v55 }
 0x192   :  { %669 = vst.msk [vmem:[%s1077_s5 + $0x8] sm:$0xf] %vm666_vm3, %v716_v53  ;;  %v714_v36 = vpack.c.bf16 %v586_v41, %v586_v41  ;;  %vm564_vm5 = vcmp.ge.f32.partialorder %v532_v54, 0.0  ;;  %v580_v59 = vmul.f32 0.1, %v532_v54  ;;  %v524_v60 = vadd.f32 %v990_v52, %v523_v56  ;;  %v752_v27 = vpop.f32.mrf.mxu1 }
 0x193   :  { %v589_v28 = vsel %vm557_vm2, %v503_v15, %v573_v57  ;;  %vm555_vm6 = vcmp.ge.f32.partialorder %v495_v58, 0.0  ;;  %v571_v61 = vmul.f32 0.1, %v495_v58  ;;  %v535_v62 = vadd.f32 %v752_v27, %v990_v52 }
 0x194   :  { %667 = vst.msk [vmem:[%s1077_s5] sm:$0xf] %vm666_vm3, %v714_v36  ;;  %v717_v63 = vpack.c.bf16 %v589_v28, %v589_v28  ;;  %v596_v5 = vsel %vm564_vm5, %v532_v54, %v580_v59  ;;  %vm562_vm7 = vcmp.ge.f32.partialorder %v524_v60, 0.0  ;;  %v578_v0 = vmul.f32 0.1, %v524_v60  ;;  %v526_v1 = vpop.f32.mrf.mxu1 }
 0x195   :  { %v724_v2 = vpack.c.bf16 %v596_v5, %v596_v5  ;;  %v587_v42 = vsel %vm555_vm6, %v495_v58, %v571_v61  ;;  %vm565_vm8 = vcmp.ge.f32.partialorder %v535_v62, 0.0  ;;  %v581_v3 = vmul.f32 0.1, %v535_v62 }
 0x196   :  { %670 = vst.msk [vmem:[%s1077_s5 + $0xc] sm:$0xf] %vm666_vm3, %v717_v63  ;;  %v715_v38 = vpack.c.bf16 %v587_v42, %v587_v42  ;;  %v594_v46 = vsel %vm562_vm7, %v524_v60, %v578_v0  ;;  %v527_v4 = vadd.f32 %v990_v52, %v526_v1 }
 0x197   :  { %677 = vst.msk [vmem:[%s1077_s5 + $0x28] sm:$0xf] %vm666_vm3, %v724_v2  ;;  %v722_v6 = vpack.c.bf16 %v594_v46, %v594_v46  ;;  %v597_v7 = vsel %vm565_vm8, %v535_v62, %v581_v3 }
 0x198   :  { %668 = vst.msk [vmem:[%s1077_s5 + $0x4] sm:$0xf] %vm666_vm3, %v715_v38  ;;  %v725_v8 = vpack.c.bf16 %v597_v7, %v597_v7  ;;  %vm563_vm9 = vcmp.ge.f32.partialorder %v527_v4, 0.0  ;;  %v579_v9 = vmul.f32 0.1, %v527_v4 }
 0x199   :  { %675 = vst.msk [vmem:[%s1077_s5 + $0x20] sm:$0xf] %vm666_vm3, %v722_v6 }
 0x19a   :  { %678 = vst.msk [vmem:[%s1077_s5 + $0x2c] sm:$0xf] %vm666_vm3, %v725_v8  ;;  %v595_v11 = vsel %vm563_vm9, %v527_v4, %v579_v9 }
 0x19b   :  { %v723_v13 = vpack.c.bf16 %v595_v11, %v595_v11 }
 0x19d   :  { %676 = vst.msk [vmem:[%s1077_s5 + $0x24] sm:$0xf] %vm666_vm3, %v723_v13 }
 0x1ac   :  { %v747_v14 = vpop.f32.mrf.mxu0 }
 0x1ad   :  { %v516_v16 = vadd.f32 %v747_v14, %v990_v52 }
 0x1ae   :  { %v507_v17 = vpop.f32.mrf.mxu0 }
 0x1af   :  { %vm560_vm10 = vcmp.ge.f32.partialorder %v516_v16, 0.0  ;;  %v576_v47 = vmul.f32 0.1, %v516_v16  ;;  %v508_v18 = vadd.f32 %v990_v52, %v507_v17 }
 0x1b0   :  { %v748_v19 = vpop.f32.mrf.mxu0  ;;  %v755_v20 = vpop.f32.mrf.mxu1 }
 0x1b1   :  { %v592_v21 = vsel %vm560_vm10, %v516_v16, %v576_v47  ;;  %vm558_vm11 = vcmp.ge.f32.partialorder %v508_v18, 0.0  ;;  %v574_v22 = vmul.f32 0.1, %v508_v18  ;;  %v519_v23 = vadd.f32 %v748_v19, %v990_v52 }
 0x1b2   :  { %v720_v44 = vpack.c.bf16 %v592_v21, %v592_v21  ;;  %v548_v12 = vadd.f32 %v755_v20, %v990_v52  ;;  %v510_v31 = vpop.f32.mrf.mxu0  ;;  %v539_v33 = vpop.f32.mrf.mxu1 }
 0x1b3   :  { %v590_v34 = vsel %vm558_vm11, %v508_v18, %v574_v22  ;;  %vm561_vm12 = vcmp.ge.f32.partialorder %v519_v23, 0.0  ;;  %v577_v24 = vmul.f32 0.1, %v519_v23  ;;  %v511_v35 = vadd.f32 %v990_v52, %v510_v31 }
 0x1b4   :  { %673 = vst.msk [vmem:[%s1077_s5 + $0x18] sm:$0xf] %vm666_vm3, %v720_v44  ;;  %v718_v39 = vpack.c.bf16 %v590_v34, %v590_v34  ;;  %vm568_vm13 = vcmp.ge.f32.partialorder %v548_v12, 0.0  ;;  %v584_v40 = vmul.f32 0.1, %v548_v12  ;;  %v540_v30 = vadd.f32 %v990_v52, %v539_v33  ;;  %v756_v43 = vpop.f32.mrf.mxu1 }
 0x1b5   :  { %v593_v45 = vsel %vm561_vm12, %v519_v23, %v577_v24  ;;  %vm559_vm14 = vcmp.ge.f32.partialorder %v511_v35, 0.0  ;;  %v575_v25 = vmul.f32 0.1, %v511_v35  ;;  %v551_v26 = vadd.f32 %v756_v43, %v990_v52 }
 0x1b6   :  { %671 = vst.msk [vmem:[%s1077_s5 + $0x10] sm:$0xf] %vm666_vm3, %v718_v39  ;;  %v721_v10 = vpack.c.bf16 %v593_v45, %v593_v45  ;;  %v600_v48 = vsel %vm568_vm13, %v548_v12, %v584_v40  ;;  %vm566_vm15 = vcmp.ge.f32.partialorder %v540_v30, 0.0  ;;  %v582_v49 = vmul.f32 0.1, %v540_v30  ;;  %v542_v29 = vpop.f32.mrf.mxu1 }
 0x1b7   :  { %v728_v50 = vpack.c.bf16 %v600_v48, %v600_v48  ;;  %v591_v37 = vsel %vm559_vm14, %v511_v35, %v575_v25  ;;  %vm569_vm0 = vcmp.ge.f32.partialorder %v551_v26, 0.0  ;;  %v585_v32 = vmul.f32 0.1, %v551_v26 }
 0x1b8   :  { %674 = vst.msk [vmem:[%s1077_s5 + $0x1c] sm:$0xf] %vm666_vm3, %v721_v10  ;;  %v719_v51 = vpack.c.bf16 %v591_v37, %v591_v37  ;;  %v598_v15 = vsel %vm566_vm15, %v540_v30, %v582_v49  ;;  %v543_v53 = vadd.f32 %v990_v52, %v542_v29 }
 0x1b9   :  { %681 = vst.msk [vmem:[%s1077_s5 + $0x38] sm:$0xf] %vm666_vm3, %v728_v50  ;;  %v726_v54 = vpack.c.bf16 %v598_v15, %v598_v15  ;;  %v601_v55 = vsel %vm569_vm0, %v551_v26, %v585_v32 }
 0x1ba   :  { %672 = vst.msk [vmem:[%s1077_s5 + $0x14] sm:$0xf] %vm666_vm3, %v719_v51  ;;  %v729_v56 = vpack.c.bf16 %v601_v55, %v601_v55  ;;  %vm567_vm1 = vcmp.ge.f32.partialorder %v543_v53, 0.0  ;;  %v583_v41 = vmul.f32 0.1, %v543_v53 }
 0x1bb   :  { %679 = vst.msk [vmem:[%s1077_s5 + $0x30] sm:$0xf] %vm666_vm3, %v726_v54 }
 0x1bc   :  { %682 = vst.msk [vmem:[%s1077_s5 + $0x3c] sm:$0xf] %vm666_vm3, %v729_v56  ;;  %v599_v52 = vsel %vm567_vm1, %v543_v53, %v583_v41 }
 0x1bd   :  { %v727_v57 = vpack.c.bf16 %v599_v52, %v599_v52 }
 0x1bf   :  { %680 = vst.msk [vmem:[%s1077_s5 + $0x34] sm:$0xf] %vm666_vm3, %v727_v57 }

</bundles_post_ra>
